<compile_context>
chip_gen: v7x
topology: tpu7x:2x2x1
jax: 0.10.0
libtpu: 0.0.40
codegen_flags: <defaults>
</compile_context>

<pallas_src>
import jax
import jax.numpy as jnp
from jax.experimental import pallas as pl
from jax.experimental.pallas import tpu as pltpu

# fc1..fc8 widths straight from the PyTorch module.
DIMS = [1, 5, 8, 10, 10, 10, 8, 5, 1]
NUM_LAYERS = len(DIMS) - 1          # 8 linear layers
PAD = 16                            # every layer width zero-padded to 16 (max width is 10)
DEFAULT_TILE_B = 16384              # samples per grid step (multiple of 128)


def funcnet1_kernel(x_ref, w_ref, o_ref):
    """One batch tile.

    x_ref: (1, TILE_B)             batch on lanes, f32
    w_ref: (PAD, NUM_LAYERS*PAD)   lane-dense packed weights, f32.
                                   Layer l = w_ref[:, l*16:(l+1)*16] in PyTorch (out,in)
                                   orientation; its bias sits in column 15 and
                                   w[15, l*16+15] == 1 for fc1..fc7 (ones-row trick).
    o_ref: (1, TILE_B)
    """
    x = x_ref[...]                                    # (1, TILE_B) f32
    w_f32 = w_ref[...]                                # (16, 128) f32, 2 vregs
    w_bf16 = w_f32.astype(jnp.bfloat16)               # one cheap cast, reused every layer

    # fc1 (fan_in = 1): VPU outer product in f32. Column 15 of layer-0 holds the bias
    # plus a 1.0 in row 15, so ReLU leaves row 15 == 1 (seeds the fused-bias ones row).
    w0 = w_f32[:, 0:1]                                # (16, 1)
    b0 = w_f32[:, PAD - 1:PAD]                        # (16, 1), b0[15] == 1.0
    h = jnp.maximum(w0 * x + b0, 0.0)                 # (16, TILE_B) f32

    # fc2..fc7: uniform (16,16)@(16,TILE_B) bf16 MXU matmuls, f32 accumulate.
    # Bias is column 15 of W times the ones row; no separate VPU bias add.
    for l in range(1, NUM_LAYERS - 1):
        wl = w_bf16[:, l * PAD:(l + 1) * PAD]         # (16, 16) bf16
        h = jnp.dot(wl, h.astype(jnp.bfloat16), preferred_element_type=jnp.float32)
        h = jnp.maximum(h, 0.0)                       # also re-yields the ones row (ReLU(1)=1)

    # fc8: no ReLU; only output row 0 is valid.
    wl = w_bf16[:, (NUM_LAYERS - 1) * PAD:]           # (16, 16) bf16
    h = jnp.dot(wl, h.astype(jnp.bfloat16), preferred_element_type=jnp.float32)
    o_ref[...] = h[0:1, :].astype(o_ref.dtype)


def pack_params(params):
    """params: list of (w, b) in PyTorch layout (w: (out,in), b: (out,)).
    Returns one lane-dense f32 slab (PAD, NUM_LAYERS*PAD) with bias fused into
    column 15 of each 16x16 layer block and the ones-row diagonal set for fc1..fc7."""
    w_slab = jnp.zeros((PAD, NUM_LAYERS * PAD), jnp.float32)
    for l, (w, b) in enumerate(params):
        w = jnp.asarray(w, jnp.float32)
        b = jnp.asarray(b, jnp.float32).reshape(-1)
        o, i = w.shape
        w_slab = w_slab.at[:o, l * PAD:l * PAD + i].set(w)
        w_slab = w_slab.at[:o, l * PAD + PAD - 1].set(b)          # bias -> column 15
        if l < NUM_LAYERS - 1:                                    # propagate the ones row
            w_slab = w_slab.at[PAD - 1, l * PAD + PAD - 1].set(1.0)
    return w_slab


def _round_up(v, m):
    return ((v + m - 1) // m) * m


def funcnet1_forward(x, w_slab, *, tile_b=DEFAULT_TILE_B):
    """x: (N,) or (N,1) float32; w_slab: packed (PAD, NUM_LAYERS*PAD) slab from
    pack_params (pack once, reuse across calls). Returns (N, 1) float32."""
    x = jnp.asarray(x, jnp.float32).reshape(-1)
    n = x.shape[0]
    # Big tiles amortize per-step overhead, but keep >= 2 grid steps when possible so the
    # "parallel" batch axis actually feeds both v7x TensorCores.
    tile = max(128, min(_round_up(tile_b, 128), _round_up(max(pl.cdiv(n, 2), 1), 128)))
    n_pad = _round_up(n, tile)
    x_slab = jnp.pad(x, (0, n_pad - n)).reshape(1, n_pad)          # lane-dense HBM slab

    compiler_kwargs = dict(dimension_semantics=("parallel",))
    # Rough per-step VMEM: f32 activation + bf16 copy (~96 B/sample) + double-buffered
    # in/out tiles. Only raise the scoped limit when a huge tile would exceed v5e's
    # 16 MiB default; normal tiles stay well inside every generation's default.
    est_vmem = 160 * tile
    if est_vmem > 12 * 1024 * 1024:
        compiler_kwargs["vmem_limit_bytes"] = int(est_vmem * 3 // 2)

    out_slab = pl.pallas_call(
        funcnet1_kernel,
        out_shape=jax.ShapeDtypeStruct((1, n_pad), jnp.float32),
        grid_spec=pltpu.PrefetchScalarGridSpec(
            num_scalar_prefetch=0,
            grid=(n_pad // tile,),
            in_specs=[
                pl.BlockSpec((1, tile), lambda i: (0, i)),                 # x tile
                pl.BlockSpec((PAD, NUM_LAYERS * PAD), lambda i: (0, 0)),   # weights (resident)
            ],
            out_specs=pl.BlockSpec((1, tile), lambda i: (0, i)),
        ),
        compiler_params=pltpu.CompilerParams(**compiler_kwargs),
    )(x_slab, w_slab)
    return out_slab[0, :n].reshape(n, 1)


def init_params(key):
    """PyTorch nn.Linear default init: U(-1/sqrt(fan_in), 1/sqrt(fan_in)) for w and b,
    weights kept in PyTorch (out, in) orientation."""
    params = []
    for l in range(NUM_LAYERS):
        fan_in, fan_out = DIMS[l], DIMS[l + 1]
        key, kw, kb = jax.random.split(key, 3)
        bound = 1.0 / float(fan_in) ** 0.5
        w = jax.random.uniform(kw, (fan_out, fan_in), jnp.float32, -bound, bound)
        b = jax.random.uniform(kb, (fan_out,), jnp.float32, -bound, bound)
        params.append((w, b))
    return params


def funcnet1_ref_f32(x, params):
    """Pure-f32 JAX reference of the PyTorch forward. x: (N, 1)."""
    h = x
    for l, (w, b) in enumerate(params):
        h = h @ w.T + b[None, :]
        if l < NUM_LAYERS - 1:
            h = jnp.maximum(h, 0.0)
    return h


def funcnet1_ref_emulated(x, params):
    """Reference mirroring the kernel numerics: fc1 in f32, fc2..fc8 with bf16 operands
    (bias rides in the bf16 weight slab) and f32 accumulation. x: (N, 1)."""
    w0, b0 = params[0]
    h = jnp.maximum(x @ w0.T + b0[None, :], 0.0)
    for l in range(1, NUM_LAYERS):
        w, b = params[l]
        h = (jnp.dot(h.astype(jnp.bfloat16), w.T.astype(jnp.bfloat16),
                     preferred_element_type=jnp.float32)
             + b.astype(jnp.bfloat16).astype(jnp.float32)[None, :])
        if l < NUM_LAYERS - 1:
            h = jnp.maximum(h, 0.0)
    return h


if __name__ == "__main__":
    key = jax.random.PRNGKey(0)
    params = init_params(key)
    w_slab = pack_params(params)       # packed ONCE, outside the forward call

    # Same sample points as the PyTorch spec: torch.arange(1.0, 4.0, 0.001) -> 3000 pts.
    n = 3000
    x = 1.0 + 0.001 * jnp.arange(n, dtype=jnp.float32)

    fwd = jax.jit(funcnet1_forward, static_argnames=("tile_b",))
    out = jax.block_until_ready(fwd(x, w_slab, tile_b=DEFAULT_TILE_B))

    x2 = x.reshape(n, 1)
    ref_emul = funcnet1_ref_emulated(x2, params)   # same bf16/f32 numerics as the kernel
    ref_f32 = funcnet1_ref_f32(x2, params)         # original module semantics, full f32

    assert out.shape == (n, 1)
    assert jnp.allclose(out, ref_emul, atol=5e-3, rtol=5e-3), "mismatch vs bf16-emulated reference"
    assert jnp.allclose(out, ref_f32, atol=1e-1, rtol=1e-1), "mismatch vs f32 reference"
    print("KERNEL_OK")
</pallas_src>

<mosaic_0001>
module attributes {stable_mosaic.version = 11 : i64} {
  func.func @funcnet1_kernel(%arg0: i32, %arg1: memref<1x1536xf32, #tpu.memory_space<vmem>>, %arg2: memref<16x128xf32, #tpu.memory_space<vmem>>, %arg3: memref<1x1536xf32, #tpu.memory_space<vmem>>) attributes {dimension_semantics = [#tpu.dimension_semantics<parallel>], iteration_bounds = array<i64: 2>, scalar_prefetch = 0 : i64, scratch_operands = 0 : i64, tpu.core_type = #tpu.core_type<tc>, window_params = [{transform_indices = @transform_0, window_bounds = array<i64: 1, 1536>}, {pipeline_mode = #tpu.pipeline_mode<synchronous>, transform_indices = @transform_1, window_bounds = array<i64: 16, 128>}, {transform_indices = @transform_2, window_bounds = array<i64: 1, 1536>}]} {
    %c0 = arith.constant 0 : index
    %c0_0 = arith.constant 0 : index
    %0 = vector.load %arg1[%c0, %c0_0] : memref<1x1536xf32, #tpu.memory_space<vmem>>, vector<1x1536xf32>
    %c0_1 = arith.constant 0 : index
    %c0_2 = arith.constant 0 : index
    %1 = vector.load %arg2[%c0_1, %c0_2] : memref<16x128xf32, #tpu.memory_space<vmem>>, vector<16x128xf32>
    %2 = arith.truncf %1 : vector<16x128xf32> to vector<16x128xbf16>
    %3 = vector.extract_strided_slice %1 {offsets = [0, 0], sizes = [16, 1], strides = [1, 1]} : vector<16x128xf32> to vector<16x1xf32>
    %4 = vector.extract_strided_slice %1 {offsets = [0, 15], sizes = [16, 1], strides = [1, 1]} : vector<16x128xf32> to vector<16x1xf32>
    %5 = vector.broadcast %3 : vector<16x1xf32> to vector<16x1536xf32>
    %6 = vector.broadcast %0 : vector<1x1536xf32> to vector<16x1536xf32>
    %7 = arith.mulf %5, %6 : vector<16x1536xf32>
    %8 = vector.broadcast %4 : vector<16x1xf32> to vector<16x1536xf32>
    %9 = arith.addf %7, %8 : vector<16x1536xf32>
    %cst = arith.constant 0.000000e+00 : f32
    %10 = vector.broadcast %cst : f32 to vector<16x1536xf32>
    %11 = arith.maximumf %9, %10 : vector<16x1536xf32>
    %12 = vector.extract_strided_slice %2 {offsets = [0, 16], sizes = [16, 16], strides = [1, 1]} : vector<16x128xbf16> to vector<16x16xbf16>
    %13 = arith.truncf %11 : vector<16x1536xf32> to vector<16x1536xbf16>
    %cst_3 = arith.constant dense<0.000000e+00> : vector<16x1536xf32>
    %14 = tpu.matmul %12, %13, %cst_3 {dimension_numbers = #tpu.dot_dimension_numbers<[1], [0], [0], [1], [0, 0, 1, 1], [], []>} : vector<16x16xbf16>, vector<16x1536xbf16>, vector<16x1536xf32> -> vector<16x1536xf32>
    %cst_4 = arith.constant 0.000000e+00 : f32
    %15 = vector.broadcast %cst_4 : f32 to vector<16x1536xf32>
    %16 = arith.maximumf %14, %15 : vector<16x1536xf32>
    %17 = vector.extract_strided_slice %2 {offsets = [0, 32], sizes = [16, 16], strides = [1, 1]} : vector<16x128xbf16> to vector<16x16xbf16>
    %18 = arith.truncf %16 : vector<16x1536xf32> to vector<16x1536xbf16>
    %cst_5 = arith.constant dense<0.000000e+00> : vector<16x1536xf32>
    %19 = tpu.matmul %17, %18, %cst_5 {dimension_numbers = #tpu.dot_dimension_numbers<[1], [0], [0], [1], [0, 0, 1, 1], [], []>} : vector<16x16xbf16>, vector<16x1536xbf16>, vector<16x1536xf32> -> vector<16x1536xf32>
    %cst_6 = arith.constant 0.000000e+00 : f32
    %20 = vector.broadcast %cst_6 : f32 to vector<16x1536xf32>
    %21 = arith.maximumf %19, %20 : vector<16x1536xf32>
    %22 = vector.extract_strided_slice %2 {offsets = [0, 48], sizes = [16, 16], strides = [1, 1]} : vector<16x128xbf16> to vector<16x16xbf16>
    %23 = arith.truncf %21 : vector<16x1536xf32> to vector<16x1536xbf16>
    %cst_7 = arith.constant dense<0.000000e+00> : vector<16x1536xf32>
    %24 = tpu.matmul %22, %23, %cst_7 {dimension_numbers = #tpu.dot_dimension_numbers<[1], [0], [0], [1], [0, 0, 1, 1], [], []>} : vector<16x16xbf16>, vector<16x1536xbf16>, vector<16x1536xf32> -> vector<16x1536xf32>
    %cst_8 = arith.constant 0.000000e+00 : f32
    %25 = vector.broadcast %cst_8 : f32 to vector<16x1536xf32>
    %26 = arith.maximumf %24, %25 : vector<16x1536xf32>
    %27 = vector.extract_strided_slice %2 {offsets = [0, 64], sizes = [16, 16], strides = [1, 1]} : vector<16x128xbf16> to vector<16x16xbf16>
    %28 = arith.truncf %26 : vector<16x1536xf32> to vector<16x1536xbf16>
    %cst_9 = arith.constant dense<0.000000e+00> : vector<16x1536xf32>
    %29 = tpu.matmul %27, %28, %cst_9 {dimension_numbers = #tpu.dot_dimension_numbers<[1], [0], [0], [1], [0, 0, 1, 1], [], []>} : vector<16x16xbf16>, vector<16x1536xbf16>, vector<16x1536xf32> -> vector<16x1536xf32>
    %cst_10 = arith.constant 0.000000e+00 : f32
    %30 = vector.broadcast %cst_10 : f32 to vector<16x1536xf32>
    %31 = arith.maximumf %29, %30 : vector<16x1536xf32>
    %32 = vector.extract_strided_slice %2 {offsets = [0, 80], sizes = [16, 16], strides = [1, 1]} : vector<16x128xbf16> to vector<16x16xbf16>
    %33 = arith.truncf %31 : vector<16x1536xf32> to vector<16x1536xbf16>
    %cst_11 = arith.constant dense<0.000000e+00> : vector<16x1536xf32>
    %34 = tpu.matmul %32, %33, %cst_11 {dimension_numbers = #tpu.dot_dimension_numbers<[1], [0], [0], [1], [0, 0, 1, 1], [], []>} : vector<16x16xbf16>, vector<16x1536xbf16>, vector<16x1536xf32> -> vector<16x1536xf32>
    %cst_12 = arith.constant 0.000000e+00 : f32
    %35 = vector.broadcast %cst_12 : f32 to vector<16x1536xf32>
    %36 = arith.maximumf %34, %35 : vector<16x1536xf32>
    %37 = vector.extract_strided_slice %2 {offsets = [0, 96], sizes = [16, 16], strides = [1, 1]} : vector<16x128xbf16> to vector<16x16xbf16>
    %38 = arith.truncf %36 : vector<16x1536xf32> to vector<16x1536xbf16>
    %cst_13 = arith.constant dense<0.000000e+00> : vector<16x1536xf32>
    %39 = tpu.matmul %37, %38, %cst_13 {dimension_numbers = #tpu.dot_dimension_numbers<[1], [0], [0], [1], [0, 0, 1, 1], [], []>} : vector<16x16xbf16>, vector<16x1536xbf16>, vector<16x1536xf32> -> vector<16x1536xf32>
    %cst_14 = arith.constant 0.000000e+00 : f32
    %40 = vector.broadcast %cst_14 : f32 to vector<16x1536xf32>
    %41 = arith.maximumf %39, %40 : vector<16x1536xf32>
    %42 = vector.extract_strided_slice %2 {offsets = [0, 112], sizes = [16, 16], strides = [1, 1]} : vector<16x128xbf16> to vector<16x16xbf16>
    %43 = arith.truncf %41 : vector<16x1536xf32> to vector<16x1536xbf16>
    %cst_15 = arith.constant dense<0.000000e+00> : vector<16x1536xf32>
    %44 = tpu.matmul %42, %43, %cst_15 {dimension_numbers = #tpu.dot_dimension_numbers<[1], [0], [0], [1], [0, 0, 1, 1], [], []>} : vector<16x16xbf16>, vector<16x1536xbf16>, vector<16x1536xf32> -> vector<16x1536xf32>
    %45 = vector.extract_strided_slice %44 {offsets = [0, 0], sizes = [1, 1536], strides = [1, 1]} : vector<16x1536xf32> to vector<1x1536xf32>
    %c0_16 = arith.constant 0 : index
    %c0_17 = arith.constant 0 : index
    %46 = vector.load %arg3[%c0_16, %c0_17] : memref<1x1536xf32, #tpu.memory_space<vmem>>, vector<1x1536xf32>
    tpu.vector_store %arg3[%c0_16, %c0_17], %45 {strides = array<i32>} : memref<1x1536xf32, #tpu.memory_space<vmem>>, vector<1x1536xf32>,
    return
  }
  func.func @transform_0(%arg0: i32) -> (i32, i32) {
    %c0_i32 = arith.constant 0 : i32
    %c0_i32_0 = arith.constant 0 : i32
    return %c0_i32, %arg0 : i32, i32
  }
  func.func @transform_1(%arg0: i32) -> (i32, i32) {
    %c0_i32 = arith.constant 0 : i32
    %c0_i32_0 = arith.constant 0 : i32
    %c0_i32_1 = arith.constant 0 : i32
    return %c0_i32, %c0_i32_0 : i32, i32
  }
  func.func @transform_2(%arg0: i32) -> (i32, i32) {
    %c0_i32 = arith.constant 0 : i32
    %c0_i32_0 = arith.constant 0 : i32
    return %c0_i32, %arg0 : i32, i32
  }
}

</mosaic_0001>

<bundles_post_ra>
// kernel: funcnet1_forward.1
= control target key start
LH: loop header
LB: loop body
LE: loop exit
PB: predicated region body
PF: predicated region fallthrough
CT: control target
= control target key end

     0   :  { %s2602_s9 = smov 0   ;;  %s2804_s0 = inlined_call_operand.vmem [shape: f32[1,3072], index: 0, kind: input, shape index: {}]   ;;  %s2805_s1 = inlined_call_operand.vmem [shape: f32[16,128], index: 1, kind: input, shape index: {}]   ;;  %s2806_s2 = inlined_call_operand.vmem [shape: f32[1,3072], index: 2, kind: output, shape index: {}]  }
   0x1 LB: > { %s2499_s10 = sadd.s32 4294967295, %s2575_s9   ;;  %p2503_p0 = scmp.ge.s32.totalorder %s2575_s9, 1  ;;  %s2575_s9 = sphi %s2602_s9, %s12_s9  }
   0x2   : > { %p112_p1 = scmp.lt.s32.totalorder %s2575_s9, 3 }
   0x4   : > { %p113_p2 = pnand %p2503_p0, %p112_p1 }
   0x5   : > { %v145_v0 = vld [vmem:[%s2805_s1] sm:$0xff] (!%p113_p2)  ;;  %v2577_v1 = vmov (!%p113_p2), 15   ;;  %v2578_v2 = vmov (!%p113_p2), 0   ;;  %v146_v3 = vld [vmem:[%s2805_s1 + $0x8] sm:$0xff] (!%p113_p2)  ;;  %s2579_s15 = smov (!%p113_p2), 112   ;;  %s2580_s16 = smov (!%p113_p2), 96   ;;  %v160_v5 = vlaneseq (!%p113_p2) }
   0x6   : > { %116 = sbr.rel (%p113_p2) target bundleno = 1727 (0x6bf), region = 28  ;;  %2567 = vset.pattern.permute.xlu1 (!%p113_p2), %v2577_v1  ;;  %2566 = vset.pattern.permute.xlu0 (!%p113_p2), %v2578_v2  ;;  %v2619_v4 = vpack.c.bf16 (!%p113_p2), %v146_v3, %v145_v0  ;;  %vm315_vm0 = vcmask (!%p113_p2), 130048   ;;  %s2581_s21 = smov (!%p113_p2), 80  }
   0x7   : > { %245 = vperm.xlu1 (!%p113_p2), %2567, %v145_v0   ;;  %150 = vperm.xlu0 (!%p113_p2), %2566, %v145_v0   ;;  %s132_s17 = smul.u32 (!%p113_p2), 12, %s2499_s10  ;;  %v2626_v6 = vshrl.u32 (!%p113_p2), %v160_v5, 7  ;;  %s2582_s22 = smov (!%p113_p2), 64   ;;  %vm2449_vm1 = vcmp.lt.s32.totalorder (!%p113_p2), %v160_v5, 512 }
   0x8   : > { %351 = vmatprep.mubr.bf16.mxu0 (!%p113_p2), %v2578_v2  ;;  %394 = vmatprep.mubr.bf16.mxu1 (!%p113_p2), %v2578_v2  ;;  %s2583_s23 = smov (!%p113_p2), 48   ;;  %s2584_s24 = smov (!%p113_p2), 32  }
   0x9   : > { %p133_p3 = scmp.lt.s32.totalorder (!%p113_p2), %s132_s17, 23  ;;  %v166_v7 = vsub.s32 (!%p113_p2), 1, %v2626_v6  ;;  %v174_v8 = vsub.s32 (!%p113_p2), 3, %v2626_v6  ;;  %v162_v9 = vsub.s32 (!%p113_p2), 0, %v2626_v6  ;;  %v170_v10 = vsub.s32 (!%p113_p2), 2, %v2626_v6  ;;  %s2585_s25 = smov (!%p113_p2), 16  }
   0xa   : > { %v182_v12 = vsub.s32 (!%p113_p2), 5, %v2626_v6  ;;  %v190_v13 = vsub.s32 (!%p113_p2), 7, %v2626_v6  ;;  %v178_v14 = vsub.s32 (!%p113_p2), 4, %v2626_v6  ;;  %v186_v15 = vsub.s32 (!%p113_p2), 6, %v2626_v6 }
   0xb   : > { %249 = vperm.xlu1 (!%p113_p2), %2567, %v146_v3   ;;  %155 = vperm.xlu0 (!%p113_p2), %2566, %v146_v3  }
   0xd   : > { %s2808_s17 = smov (!%p133_p3, %s132_s17), 23 }
   0xe   : > { %s135_s20 = scalar_lea.vmem %s2804_s0, %s2808_s17  ;;  %s140_s28 = scalar_lea.vmem %s2806_s2, %s2808_s17 }
   0xf   : > { %313 = vrot.lane.b32.xlu0 %v2619_v4, %s2579_s15  ;;  %613 = vrot.lane.b32.xlu1 %v2619_v4, %s2580_s16  ;;  %v143_v11 = vld [vmem:[%s135_s20] sm:$0xff]  ;;  %v144_v18 = vld [vmem:[%s135_s20 + $0x8] sm:$0xf] }
  0x10   : > { %2568 = vset.pattern.permute.xlu0 %v2577_v1  ;;  %v167_v16 = vrot.slane %v143_v11, %v166_v7  ;;  %v175_v17 = vrot.slane %v143_v11, %v174_v8  ;;  %v163_v19 = vrot.slane %v143_v11, %v162_v9  ;;  %v171_v20 = vrot.slane %v143_v11, %v170_v10 }
  0x11   : > { %v183_v21 = vrot.slane %v143_v11, %v182_v12  ;;  %v191_v22 = vrot.slane %v143_v11, %v190_v13  ;;  %v179_v23 = vrot.slane %v143_v11, %v178_v14  ;;  %v187_v24 = vrot.slane %v143_v11, %v186_v15 }
  0x12   : > { %v2644_v27 = vrot.slane %v144_v18, %v162_v9  ;;  %v2646_v28 = vrot.slane %v144_v18, %v170_v10  ;;  %v2648_v29 = vrot.slane %v144_v18, %v166_v7  ;;  %v207_v46 = vrot.slane %v144_v18, %v174_v8 }
  0x13   : > { %912 = vrot.lane.b32.xlu0 %v2619_v4, %s2581_s21  ;;  %1211 = vrot.lane.b32.xlu1 %v2619_v4, %s2582_s22 }
  0x17   : > { %1510 = vrot.lane.b32.xlu0 %v2619_v4, %s2583_s23  ;;  %1809 = vrot.lane.b32.xlu1 %v2619_v4, %s2584_s24 }
  0x1b   : > { %2108 = vrot.lane.b32.xlu0 %v2619_v4, %s2585_s25 }
  0x86   : > { %v2640_v25 = vpop.permute.xlu1 %245  ;;  %v2642_v26 = vpop.permute.xlu0 %150 }
  0x87   : > { %v221_v30 = vmul.f32 %v167_v16, %v2642_v26  ;;  %v223_v31 = vmul.f32 %v175_v17, %v2642_v26  ;;  %v220_v32 = vmul.f32 %v163_v19, %v2642_v26  ;;  %v222_v33 = vmul.f32 %v171_v20, %v2642_v26 }
  0x88   : > { %v225_v34 = vmul.f32 %v183_v21, %v2642_v26  ;;  %v227_v35 = vmul.f32 %v191_v22, %v2642_v26  ;;  %v224_v36 = vmul.f32 %v179_v23, %v2642_v26  ;;  %v226_v37 = vmul.f32 %v187_v24, %v2642_v26 }
  0x89   : > { %v253_v38 = vadd.f32 %v2640_v25, %v221_v30  ;;  %v255_v39 = vadd.f32 %v2640_v25, %v223_v31  ;;  %v252_v40 = vadd.f32 %v2640_v25, %v220_v32  ;;  %v254_v41 = vadd.f32 %v2640_v25, %v222_v33 }
  0x8a   : > { %v2662_v42 = vpop.permute.xlu0 %155  ;;  %v257_v43 = vadd.f32 %v2640_v25, %v225_v34  ;;  %v259_v44 = vadd.f32 %v2640_v25, %v227_v35  ;;  %v256_v45 = vadd.f32 %v2640_v25, %v224_v36  ;;  %v258_v50 = vadd.f32 %v2640_v25, %v226_v37  ;;  %v2670_v51 = vpop.permute.xlu1 %249 }
  0x8b   : > { %v233_v47 = vmul.f32 %v167_v16, %v2662_v42  ;;  %v277_v48 = vmax.f32 %v253_v38, 0.0  ;;  %v235_v49 = vmul.f32 %v175_v17, %v2662_v42  ;;  %v279_v52 = vmax.f32 %v255_v39, 0.0 }
  0x8c   : > { %v232_v53 = vmul.f32 %v163_v19, %v2662_v42  ;;  %v276_v54 = vmax.f32 %v252_v40, 0.0  ;;  %v234_v55 = vmul.f32 %v171_v20, %v2662_v42  ;;  %v278_v58 = vmax.f32 %v254_v41, 0.0 }
  0x8d   : > { %v265_v56 = vadd.f32 %v2670_v51, %v233_v47  ;;  %v267_v57 = vadd.f32 %v2670_v51, %v235_v49  ;;  %v237_v59 = vmul.f32 %v183_v21, %v2662_v42  ;;  %v281_v62 = vmax.f32 %v257_v43, 0.0 }
  0x8e   : > { %v264_v60 = vadd.f32 %v2670_v51, %v232_v53  ;;  %v266_v61 = vadd.f32 %v2670_v51, %v234_v55  ;;  %v239_v63 = vmul.f32 %v191_v22, %v2662_v42  ;;  %v236_v7 = vmul.f32 %v179_v23, %v2662_v42  ;;  %v314_v31 = vpop.permute.xlu0 %313 }
  0x8f   : > { %v289_v0 = vmax.f32 %v265_v56, 0.0  ;;  %v291_v1 = vmax.f32 %v267_v57, 0.0  ;;  %v269_v3 = vadd.f32 %v2670_v51, %v237_v59  ;;  %v283_v11 = vmax.f32 %v259_v44, 0.0 }
  0x90   : > { %v288_v8 = vmax.f32 %v264_v60, 0.0  ;;  %v290_v9 = vmax.f32 %v266_v61, 0.0  ;;  %v271_v10 = vadd.f32 %v2670_v51, %v239_v63  ;;  %v268_v15 = vadd.f32 %v2670_v51, %v236_v7 }
  0x91   : > { %v301_v12 = vpack.c.bf16 %v289_v0, %v277_v48  ;;  %v303_v13 = vpack.c.bf16 %v291_v1, %v279_v52  ;;  %v293_v14 = vmax.f32 %v269_v3, 0.0  ;;  %v238_v19 = vmul.f32 %v187_v24, %v2662_v42 }
  0x92   : > { %v300_v16 = vpack.c.bf16 %v288_v8, %v276_v54  ;;  %v302_v17 = vpack.c.bf16 %v290_v9, %v278_v58  ;;  %v295_v18 = vmax.f32 %v271_v10, 0.0  ;;  %v280_v21 = vmax.f32 %v256_v45, 0.0 }
  0x93   : > { %319 = vmatprep.subr.bf16.mxu0 %v301_v12  ;;  %362 = vmatprep.subr.bf16.mxu1 %v303_v13  ;;  %v305_v20 = vpack.c.bf16 %v293_v14, %v281_v62  ;;  %v292_v22 = vmax.f32 %v268_v15, 0.0  ;;  %v229_v23 = vmul.f32 %v2648_v29, %v2642_v26  ;;  %v270_v32 = vadd.f32 %v2670_v51, %v238_v19 }
  0x94   : > { %320 = vmatpush1.bf16.msra.mxu0 %v300_v16  ;;  %363 = vmatpush1.bf16.msra.mxu1 %v302_v17  ;;  %v307_v30 = vpack.c.bf16 %v295_v18, %v283_v11  ;;  %v282_v33 = vmax.f32 %v258_v50, 0.0  ;;  %v241_v34 = vmul.f32 %v2648_v29, %v2662_v42  ;;  %v231_v36 = vmul.f32 %v207_v46, %v2642_v26  ;;  %v614_v18 = vpop.permute.xlu1 %613 }
  0x95   : > { %405 = vmatprep.subr.bf16.mxu0 %v305_v20  ;;  %v304_v24 = vpack.c.bf16 %v292_v22, %v280_v21  ;;  %v261_v35 = vadd.f32 %v2640_v25, %v229_v23  ;;  %v243_v37 = vmul.f32 %v207_v46, %v2662_v42  ;;  %v294_v38 = vmax.f32 %v270_v32, 0.0 }
  0x96   : > { %448 = vmatprep.subr.bf16.mxu1 %v307_v30  ;;  %v273_v39 = vadd.f32 %v2670_v51, %v241_v34  ;;  %v228_v40 = vmul.f32 %v2644_v27, %v2642_v26  ;;  %v240_v41 = vmul.f32 %v2644_v27, %v2662_v42  ;;  %v263_v43 = vadd.f32 %v2640_v25, %v231_v36 }
  0x97   : > { %2504 = vmatmul.mubr.msk.bf16.vlgmr.msra.gmra.mrb[0].mxu0 %vm315_vm0, %v314_v31  ;;  %2505 = vmatmul.mubr.msk.bf16.vlgmr.msra.gmra.mrb[0].mxu1 %vm315_vm0, %v314_v31  ;;  %v285_v29 = vmax.f32 %v261_v35, 0.0  ;;  %v275_v44 = vadd.f32 %v2670_v51, %v243_v37  ;;  %v230_v45 = vmul.f32 %v2646_v28, %v2642_v26  ;;  %v306_v46 = vpack.c.bf16 %v294_v38, %v282_v33 }
  0x98   : > { %406 = vmatpush1.bf16.msra.mxu0 %v304_v24  ;;  %v297_v47 = vmax.f32 %v273_v39, 0.0  ;;  %437 = vmatprep.mubr.bf16.mxu0 %v2578_v2  ;;  %v260_v48 = vadd.f32 %v2640_v25, %v228_v40  ;;  %v272_v27 = vadd.f32 %v2670_v51, %v240_v41  ;;  %v287_v49 = vmax.f32 %v263_v43, 0.0 }
  0x99   : > { %v299_v50 = vmax.f32 %v275_v44, 0.0  ;;  %480 = vmatprep.mubr.bf16.mxu1 %v2578_v2  ;;  %v242_v52 = vmul.f32 %v2646_v28, %v2662_v42  ;;  %v262_v53 = vadd.f32 %v2640_v25, %v230_v45  ;;  %449 = vmatpush1.bf16.msra.mxu1 %v306_v46 }
  0x9a   : > { %v309_v26 = vpack.c.bf16 %v297_v47, %v285_v29  ;;  %v296_v54 = vmax.f32 %v272_v27, 0.0  ;;  %v284_v57 = vmax.f32 %v260_v48, 0.0 }
  0x9b   : > { %v311_v55 = vpack.c.bf16 %v299_v50, %v287_v49  ;;  %v274_v56 = vadd.f32 %v2670_v51, %v242_v52  ;;  %v286_v58 = vmax.f32 %v262_v53, 0.0 }
  0x9c   : > { %491 = vmatprep.subr.bf16.mxu0 %v309_v26  ;;  %v308_v60 = vpack.c.bf16 %v296_v54, %v284_v57 }
  0x9d   : > { %534 = vmatprep.subr.bf16.mxu1 %v311_v55  ;;  %v298_v59 = vmax.f32 %v274_v56, 0.0 }
  0x9f   : > { %2506 = vmatmul.mubr.msk.bf16.vlgmr.msra.gmra.mrb[4].mxu0 %vm315_vm0, %v314_v31  ;;  %2507 = vmatmul.mubr.msk.bf16.vlgmr.msra.gmra.mrb[4].mxu1 %vm315_vm0, %v314_v31  ;;  %v310_v61 = vpack.c.bf16 %v298_v59, %v286_v58 }
  0xa0   : > { %492 = vmatpush1.bf16.msra.mxu0 %v308_v60  ;;  %523 = vmatprep.mubr.bf16.mxu0 %v2578_v2 }
  0xa1   : > { %535 = vmatpush1.bf16.msra.mxu1 %v310_v61  ;;  %566 = vmatprep.mubr.bf16.mxu1 %v2578_v2 }
  0xa7   : > { %2508 = vmatmul.mubr.msk.bf16.vlgmr.msra.gmra.mrb[8].mxu0 %vm315_vm0, %v314_v31  ;;  %2509 = vmatmul.mubr.msk.bf16.vlgmr.msra.gmra.mrb[8].mxu1 %vm315_vm0, %v314_v31 }
  0xa8   : > { %650 = vmatprep.mubr.bf16.mxu0 %v2578_v2  ;;  %693 = vmatprep.mubr.bf16.mxu1 %v2578_v2 }
 0x16a   : > { %v353_v25 = vpop.f32.mrb[0].mxu0  ;;  %v396_v28 = vpop.f32.mrb[0].mxu1 }
 0x16b   : > { %v355_v42 = vpop.f32.mrb[1].mxu0  ;;  %v398_v51 = vpop.f32.mrb[1].mxu1  ;;  %v577_v0 = vmax.f32 %v353_v25, 0.0  ;;  %v579_v1 = vmax.f32 %v396_v28, 0.0 }
 0x16c   : > { %v357_v62 = vpop.f32.mrb[2].mxu0  ;;  %v400_v63 = vpop.f32.mrb[2].mxu1  ;;  %v578_v10 = vmax.f32 %v355_v42, 0.0  ;;  %v580_v11 = vmax.f32 %v398_v51, 0.0 }
 0x16d   : > { %v589_v3 = vmax.f32 %v357_v62, 0.0  ;;  %v591_v7 = vmax.f32 %v400_v63, 0.0  ;;  %v359_v8 = vpop.f32.mrb[3].mxu0  ;;  %v402_v9 = vpop.f32.mrb[3].mxu1 }
 0x16e   : > { %v590_v12 = vmax.f32 %v359_v8, 0.0  ;;  %v592_v13 = vmax.f32 %v402_v9, 0.0 }
 0x16f   : > { %v601_v14 = vpack.c.bf16 %v589_v3, %v577_v0  ;;  %v603_v15 = vpack.c.bf16 %v591_v7, %v579_v1 }
 0x170   : > { %v602_v16 = vpack.c.bf16 %v590_v12, %v578_v10  ;;  %v604_v17 = vpack.c.bf16 %v592_v13, %v580_v11 }
 0x172   : > { %v439_v19 = vpop.f32.mrb[4].mxu0  ;;  %v482_v20 = vpop.f32.mrb[4].mxu1  ;;  %618 = vmatprep.subr.bf16.mxu0 %v602_v16  ;;  %661 = vmatprep.subr.bf16.mxu1 %v604_v17 }
 0x173   : > { %v441_v21 = vpop.f32.mrb[5].mxu0  ;;  %v484_v22 = vpop.f32.mrb[5].mxu1  ;;  %619 = vmatpush1.bf16.msra.mxu0 %v601_v14  ;;  %662 = vmatpush1.bf16.msra.mxu1 %v603_v15  ;;  %v581_v31 = vmax.f32 %v439_v19, 0.0  ;;  %v583_v32 = vmax.f32 %v482_v20, 0.0 }
 0x174   : > { %v443_v23 = vpop.f32.mrb[6].mxu0  ;;  %v486_v30 = vpop.f32.mrb[6].mxu1  ;;  %v582_v36 = vmax.f32 %v441_v21, 0.0  ;;  %v584_v37 = vmax.f32 %v484_v22, 0.0 }
 0x175   : > { %v593_v33 = vmax.f32 %v443_v23, 0.0  ;;  %v595_v34 = vmax.f32 %v486_v30, 0.0  ;;  %v445_v24 = vpop.f32.mrb[7].mxu0  ;;  %v488_v35 = vpop.f32.mrb[7].mxu1 }
 0x176   : > { %v594_v38 = vmax.f32 %v445_v24, 0.0  ;;  %v596_v39 = vmax.f32 %v488_v35, 0.0  ;;  %2510 = vmatmul.mubr.msk.bf16.vlgmr.msra.gmra.mrb[12].mxu0 %vm315_vm0, %v614_v18  ;;  %2511 = vmatmul.mubr.msk.bf16.vlgmr.msra.gmra.mrb[12].mxu1 %vm315_vm0, %v614_v18  ;;  %v913_v19 = vpop.permute.xlu0 %912 }
 0x177   : > { %v605_v40 = vpack.c.bf16 %v593_v33, %v581_v31  ;;  %v607_v41 = vpack.c.bf16 %v595_v34, %v583_v32  ;;  %736 = vmatprep.mubr.bf16.mxu0 %v2578_v2  ;;  %779 = vmatprep.mubr.bf16.mxu1 %v2578_v2 }
 0x178   : > { %v606_v29 = vpack.c.bf16 %v594_v38, %v582_v36  ;;  %v608_v43 = vpack.c.bf16 %v596_v39, %v584_v37 }
 0x17a   : > { %v525_v44 = vpop.f32.mrb[8].mxu0  ;;  %v568_v45 = vpop.f32.mrb[8].mxu1  ;;  %704 = vmatprep.subr.bf16.mxu0 %v606_v29  ;;  %747 = vmatprep.subr.bf16.mxu1 %v608_v43 }
 0x17b   : > { %v527_v46 = vpop.f32.mrb[9].mxu0  ;;  %v570_v47 = vpop.f32.mrb[9].mxu1  ;;  %705 = vmatpush1.bf16.msra.mxu0 %v605_v40  ;;  %748 = vmatpush1.bf16.msra.mxu1 %v607_v41  ;;  %v585_v49 = vmax.f32 %v525_v44, 0.0  ;;  %v587_v50 = vmax.f32 %v568_v45, 0.0 }
 0x17c   : > { %v529_v48 = vpop.f32.mrb[10].mxu0  ;;  %v572_v27 = vpop.f32.mrb[10].mxu1  ;;  %v586_v55 = vmax.f32 %v527_v46, 0.0  ;;  %v588_v56 = vmax.f32 %v570_v47, 0.0 }
 0x17d   : > { %v597_v52 = vmax.f32 %v529_v48, 0.0  ;;  %v599_v53 = vmax.f32 %v572_v27, 0.0  ;;  %v531_v26 = vpop.f32.mrb[11].mxu0  ;;  %v574_v54 = vpop.f32.mrb[11].mxu1 }
 0x17e   : > { %v598_v57 = vmax.f32 %v531_v26, 0.0  ;;  %v600_v58 = vmax.f32 %v574_v54, 0.0  ;;  %2512 = vmatmul.mubr.msk.bf16.vlgmr.msra.gmra.mrb[16].mxu0 %vm315_vm0, %v614_v18  ;;  %2513 = vmatmul.mubr.msk.bf16.vlgmr.msra.gmra.mrb[16].mxu1 %vm315_vm0, %v614_v18 }
 0x17f   : > { %v609_v59 = vpack.c.bf16 %v597_v52, %v585_v49  ;;  %v611_v60 = vpack.c.bf16 %v599_v53, %v587_v50  ;;  %822 = vmatprep.mubr.bf16.mxu0 %v2578_v2  ;;  %865 = vmatprep.mubr.bf16.mxu1 %v2578_v2 }
 0x180   : > { %v610_v61 = vpack.c.bf16 %v598_v57, %v586_v55  ;;  %v612_v25 = vpack.c.bf16 %v600_v58, %v588_v56 }
 0x182   : > { %790 = vmatprep.subr.bf16.mxu0 %v610_v61  ;;  %833 = vmatprep.subr.bf16.mxu1 %v612_v25 }
 0x183   : > { %791 = vmatpush1.bf16.msra.mxu0 %v609_v59  ;;  %834 = vmatpush1.bf16.msra.mxu1 %v611_v60 }
 0x186   : > { %2514 = vmatmul.mubr.msk.bf16.vlgmr.msra.gmra.mrb[20].mxu0 %vm315_vm0, %v614_v18  ;;  %2515 = vmatmul.mubr.msk.bf16.vlgmr.msra.gmra.mrb[20].mxu1 %vm315_vm0, %v614_v18 }
 0x187   : > { %949 = vmatprep.mubr.bf16.mxu0 %v2578_v2  ;;  %992 = vmatprep.mubr.bf16.mxu1 %v2578_v2 }
 0x249   : > { %v652_v28 = vpop.f32.mrb[12].mxu0  ;;  %v695_v42 = vpop.f32.mrb[12].mxu1 }
 0x24a   : > { %v654_v51 = vpop.f32.mrb[13].mxu0  ;;  %v697_v62 = vpop.f32.mrb[13].mxu1  ;;  %v876_v1 = vmax.f32 %v652_v28, 0.0  ;;  %v878_v3 = vmax.f32 %v695_v42, 0.0 }
 0x24b   : > { %v656_v63 = vpop.f32.mrb[14].mxu0  ;;  %v699_v0 = vpop.f32.mrb[14].mxu1  ;;  %v877_v11 = vmax.f32 %v654_v51, 0.0  ;;  %v879_v12 = vmax.f32 %v697_v62, 0.0 }
 0x24c   : > { %v888_v7 = vmax.f32 %v656_v63, 0.0  ;;  %v890_v8 = vmax.f32 %v699_v0, 0.0  ;;  %v658_v9 = vpop.f32.mrb[15].mxu0  ;;  %v701_v10 = vpop.f32.mrb[15].mxu1 }
 0x24d   : > { %v889_v13 = vmax.f32 %v658_v9, 0.0  ;;  %v891_v14 = vmax.f32 %v701_v10, 0.0 }
 0x24e   : > { %v900_v15 = vpack.c.bf16 %v888_v7, %v876_v1  ;;  %v902_v16 = vpack.c.bf16 %v890_v8, %v878_v3 }
 0x24f   : > { %v901_v17 = vpack.c.bf16 %v889_v13, %v877_v11  ;;  %v903_v18 = vpack.c.bf16 %v891_v14, %v879_v12 }
 0x251   : > { %v738_v20 = vpop.f32.mrb[16].mxu0  ;;  %v781_v21 = vpop.f32.mrb[16].mxu1  ;;  %917 = vmatprep.subr.bf16.mxu0 %v901_v17  ;;  %960 = vmatprep.subr.bf16.mxu1 %v903_v18 }
 0x252   : > { %v740_v22 = vpop.f32.mrb[17].mxu0  ;;  %v783_v23 = vpop.f32.mrb[17].mxu1  ;;  %918 = vmatpush1.bf16.msra.mxu0 %v900_v15  ;;  %961 = vmatpush1.bf16.msra.mxu1 %v902_v16  ;;  %v880_v32 = vmax.f32 %v738_v20, 0.0  ;;  %v882_v33 = vmax.f32 %v781_v21, 0.0 }
 0x253   : > { %v742_v30 = vpop.f32.mrb[18].mxu0  ;;  %v785_v31 = vpop.f32.mrb[18].mxu1  ;;  %v881_v37 = vmax.f32 %v740_v22, 0.0  ;;  %v883_v38 = vmax.f32 %v783_v23, 0.0 }
 0x254   : > { %v892_v34 = vmax.f32 %v742_v30, 0.0  ;;  %v894_v24 = vmax.f32 %v785_v31, 0.0  ;;  %v744_v35 = vpop.f32.mrb[19].mxu0  ;;  %v787_v36 = vpop.f32.mrb[19].mxu1 }
 0x255   : > { %v893_v39 = vmax.f32 %v744_v35, 0.0  ;;  %v895_v40 = vmax.f32 %v787_v36, 0.0  ;;  %2516 = vmatmul.mubr.msk.bf16.vlgmr.msra.gmra.mrb[24].mxu0 %vm315_vm0, %v913_v19  ;;  %2517 = vmatmul.mubr.msk.bf16.vlgmr.msra.gmra.mrb[24].mxu1 %vm315_vm0, %v913_v19  ;;  %v1212_v20 = vpop.permute.xlu1 %1211 }
 0x256   : > { %v904_v41 = vpack.c.bf16 %v892_v34, %v880_v32  ;;  %v906_v29 = vpack.c.bf16 %v894_v24, %v882_v33  ;;  %1035 = vmatprep.mubr.bf16.mxu0 %v2578_v2  ;;  %1078 = vmatprep.mubr.bf16.mxu1 %v2578_v2 }
 0x257   : > { %v905_v43 = vpack.c.bf16 %v893_v39, %v881_v37  ;;  %v907_v44 = vpack.c.bf16 %v895_v40, %v883_v38 }
 0x259   : > { %v824_v45 = vpop.f32.mrb[20].mxu0  ;;  %v867_v46 = vpop.f32.mrb[20].mxu1  ;;  %1003 = vmatprep.subr.bf16.mxu0 %v905_v43  ;;  %1046 = vmatprep.subr.bf16.mxu1 %v907_v44 }
 0x25a   : > { %v826_v47 = vpop.f32.mrb[21].mxu0  ;;  %v869_v48 = vpop.f32.mrb[21].mxu1  ;;  %1004 = vmatpush1.bf16.msra.mxu0 %v904_v41  ;;  %1047 = vmatpush1.bf16.msra.mxu1 %v906_v29  ;;  %v884_v50 = vmax.f32 %v824_v45, 0.0  ;;  %v886_v52 = vmax.f32 %v867_v46, 0.0 }
 0x25b   : > { %v828_v27 = vpop.f32.mrb[22].mxu0  ;;  %v871_v49 = vpop.f32.mrb[22].mxu1  ;;  %v885_v56 = vmax.f32 %v826_v47, 0.0  ;;  %v887_v57 = vmax.f32 %v869_v48, 0.0 }
 0x25c   : > { %v896_v53 = vmax.f32 %v828_v27, 0.0  ;;  %v898_v26 = vmax.f32 %v871_v49, 0.0  ;;  %v830_v54 = vpop.f32.mrb[23].mxu0  ;;  %v873_v55 = vpop.f32.mrb[23].mxu1 }
 0x25d   : > { %v897_v58 = vmax.f32 %v830_v54, 0.0  ;;  %v899_v59 = vmax.f32 %v873_v55, 0.0  ;;  %2518 = vmatmul.mubr.msk.bf16.vlgmr.msra.gmra.mrb[28].mxu0 %vm315_vm0, %v913_v19  ;;  %2519 = vmatmul.mubr.msk.bf16.vlgmr.msra.gmra.mrb[28].mxu1 %vm315_vm0, %v913_v19 }
 0x25e   : > { %v908_v60 = vpack.c.bf16 %v896_v53, %v884_v50  ;;  %v910_v61 = vpack.c.bf16 %v898_v26, %v886_v52  ;;  %1121 = vmatprep.mubr.bf16.mxu0 %v2578_v2  ;;  %1164 = vmatprep.mubr.bf16.mxu1 %v2578_v2 }
 0x25f   : > { %v909_v25 = vpack.c.bf16 %v897_v58, %v885_v56  ;;  %v911_v28 = vpack.c.bf16 %v899_v59, %v887_v57 }
 0x261   : > { %1089 = vmatprep.subr.bf16.mxu0 %v909_v25  ;;  %1132 = vmatprep.subr.bf16.mxu1 %v911_v28 }
 0x262   : > { %1090 = vmatpush1.bf16.msra.mxu0 %v908_v60  ;;  %1133 = vmatpush1.bf16.msra.mxu1 %v910_v61 }
 0x265   : > { %2520 = vmatmul.mubr.msk.bf16.vlgmr.msra.gmra.mrb[32].mxu0 %vm315_vm0, %v913_v19  ;;  %2521 = vmatmul.mubr.msk.bf16.vlgmr.msra.gmra.mrb[32].mxu1 %vm315_vm0, %v913_v19 }
 0x266   : > { %1248 = vmatprep.mubr.bf16.mxu0 %v2578_v2  ;;  %1291 = vmatprep.mubr.bf16.mxu1 %v2578_v2 }
 0x328   : > { %v951_v42 = vpop.f32.mrb[24].mxu0  ;;  %v994_v51 = vpop.f32.mrb[24].mxu1 }
 0x329   : > { %v953_v62 = vpop.f32.mrb[25].mxu0  ;;  %v996_v63 = vpop.f32.mrb[25].mxu1  ;;  %v1175_v3 = vmax.f32 %v951_v42, 0.0  ;;  %v1177_v7 = vmax.f32 %v994_v51, 0.0 }
 0x32a   : > { %v955_v0 = vpop.f32.mrb[26].mxu0  ;;  %v998_v1 = vpop.f32.mrb[26].mxu1  ;;  %v1176_v12 = vmax.f32 %v953_v62, 0.0  ;;  %v1178_v13 = vmax.f32 %v996_v63, 0.0 }
 0x32b   : > { %v1187_v8 = vmax.f32 %v955_v0, 0.0  ;;  %v1189_v9 = vmax.f32 %v998_v1, 0.0  ;;  %v957_v10 = vpop.f32.mrb[27].mxu0  ;;  %v1000_v11 = vpop.f32.mrb[27].mxu1 }
 0x32c   : > { %v1188_v14 = vmax.f32 %v957_v10, 0.0  ;;  %v1190_v15 = vmax.f32 %v1000_v11, 0.0 }
 0x32d   : > { %v1199_v16 = vpack.c.bf16 %v1187_v8, %v1175_v3  ;;  %v1201_v17 = vpack.c.bf16 %v1189_v9, %v1177_v7 }
 0x32e   : > { %v1200_v18 = vpack.c.bf16 %v1188_v14, %v1176_v12  ;;  %v1202_v19 = vpack.c.bf16 %v1190_v15, %v1178_v13 }
 0x330   : > { %v1037_v21 = vpop.f32.mrb[28].mxu0  ;;  %v1080_v22 = vpop.f32.mrb[28].mxu1  ;;  %1216 = vmatprep.subr.bf16.mxu0 %v1200_v18  ;;  %1259 = vmatprep.subr.bf16.mxu1 %v1202_v19 }
 0x331   : > { %v1039_v23 = vpop.f32.mrb[29].mxu0  ;;  %v1082_v30 = vpop.f32.mrb[29].mxu1  ;;  %1217 = vmatpush1.bf16.msra.mxu0 %v1199_v16  ;;  %1260 = vmatpush1.bf16.msra.mxu1 %v1201_v17  ;;  %v1179_v33 = vmax.f32 %v1037_v21, 0.0  ;;  %v1181_v34 = vmax.f32 %v1080_v22, 0.0 }
 0x332   : > { %v1041_v31 = vpop.f32.mrb[30].mxu0  ;;  %v1084_v32 = vpop.f32.mrb[30].mxu1  ;;  %v1180_v38 = vmax.f32 %v1039_v23, 0.0  ;;  %v1182_v39 = vmax.f32 %v1082_v30, 0.0 }
 0x333   : > { %v1191_v24 = vmax.f32 %v1041_v31, 0.0  ;;  %v1193_v35 = vmax.f32 %v1084_v32, 0.0  ;;  %v1043_v36 = vpop.f32.mrb[31].mxu0  ;;  %v1086_v37 = vpop.f32.mrb[31].mxu1 }
 0x334   : > { %v1192_v40 = vmax.f32 %v1043_v36, 0.0  ;;  %v1194_v41 = vmax.f32 %v1086_v37, 0.0  ;;  %2522 = vmatmul.mubr.msk.bf16.vlgmr.msra.gmra.mrb[36].mxu0 %vm315_vm0, %v1212_v20  ;;  %2523 = vmatmul.mubr.msk.bf16.vlgmr.msra.gmra.mrb[36].mxu1 %vm315_vm0, %v1212_v20  ;;  %v1511_v21 = vpop.permute.xlu0 %1510 }
 0x335   : > { %v1203_v29 = vpack.c.bf16 %v1191_v24, %v1179_v33  ;;  %v1205_v43 = vpack.c.bf16 %v1193_v35, %v1181_v34  ;;  %1334 = vmatprep.mubr.bf16.mxu0 %v2578_v2  ;;  %1377 = vmatprep.mubr.bf16.mxu1 %v2578_v2 }
 0x336   : > { %v1204_v44 = vpack.c.bf16 %v1192_v40, %v1180_v38  ;;  %v1206_v45 = vpack.c.bf16 %v1194_v41, %v1182_v39 }
 0x338   : > { %v1123_v46 = vpop.f32.mrb[32].mxu0  ;;  %v1166_v47 = vpop.f32.mrb[32].mxu1  ;;  %1302 = vmatprep.subr.bf16.mxu0 %v1204_v44  ;;  %1345 = vmatprep.subr.bf16.mxu1 %v1206_v45 }
 0x339   : > { %v1125_v48 = vpop.f32.mrb[33].mxu0  ;;  %v1168_v27 = vpop.f32.mrb[33].mxu1  ;;  %1303 = vmatpush1.bf16.msra.mxu0 %v1203_v29  ;;  %1346 = vmatpush1.bf16.msra.mxu1 %v1205_v43  ;;  %v1183_v52 = vmax.f32 %v1123_v46, 0.0  ;;  %v1185_v53 = vmax.f32 %v1166_v47, 0.0 }
 0x33a   : > { %v1127_v49 = vpop.f32.mrb[34].mxu0  ;;  %v1170_v50 = vpop.f32.mrb[34].mxu1  ;;  %v1184_v57 = vmax.f32 %v1125_v48, 0.0  ;;  %v1186_v58 = vmax.f32 %v1168_v27, 0.0 }
 0x33b   : > { %v1195_v26 = vmax.f32 %v1127_v49, 0.0  ;;  %v1197_v54 = vmax.f32 %v1170_v50, 0.0  ;;  %v1129_v55 = vpop.f32.mrb[35].mxu0  ;;  %v1172_v56 = vpop.f32.mrb[35].mxu1 }
 0x33c   : > { %v1196_v59 = vmax.f32 %v1129_v55, 0.0  ;;  %v1198_v60 = vmax.f32 %v1172_v56, 0.0  ;;  %2524 = vmatmul.mubr.msk.bf16.vlgmr.msra.gmra.mrb[40].mxu0 %vm315_vm0, %v1212_v20  ;;  %2525 = vmatmul.mubr.msk.bf16.vlgmr.msra.gmra.mrb[40].mxu1 %vm315_vm0, %v1212_v20 }
 0x33d   : > { %v1207_v61 = vpack.c.bf16 %v1195_v26, %v1183_v52  ;;  %v1209_v25 = vpack.c.bf16 %v1197_v54, %v1185_v53  ;;  %1420 = vmatprep.mubr.bf16.mxu0 %v2578_v2  ;;  %1463 = vmatprep.mubr.bf16.mxu1 %v2578_v2 }
 0x33e   : > { %v1208_v28 = vpack.c.bf16 %v1196_v59, %v1184_v57  ;;  %v1210_v42 = vpack.c.bf16 %v1198_v60, %v1186_v58 }
 0x340   : > { %1388 = vmatprep.subr.bf16.mxu0 %v1208_v28  ;;  %1431 = vmatprep.subr.bf16.mxu1 %v1210_v42 }
 0x341   : > { %1389 = vmatpush1.bf16.msra.mxu0 %v1207_v61  ;;  %1432 = vmatpush1.bf16.msra.mxu1 %v1209_v25 }
 0x344   : > { %2526 = vmatmul.mubr.msk.bf16.vlgmr.msra.gmra.mrb[44].mxu0 %vm315_vm0, %v1212_v20  ;;  %2527 = vmatmul.mubr.msk.bf16.vlgmr.msra.gmra.mrb[44].mxu1 %vm315_vm0, %v1212_v20 }
 0x345   : > { %1547 = vmatprep.mubr.bf16.mxu0 %v2578_v2  ;;  %1590 = vmatprep.mubr.bf16.mxu1 %v2578_v2 }
 0x407   : > { %v1250_v51 = vpop.f32.mrb[36].mxu0  ;;  %v1293_v62 = vpop.f32.mrb[36].mxu1 }
 0x408   : > { %v1252_v63 = vpop.f32.mrb[37].mxu0  ;;  %v1295_v0 = vpop.f32.mrb[37].mxu1  ;;  %v1474_v7 = vmax.f32 %v1250_v51, 0.0  ;;  %v1476_v8 = vmax.f32 %v1293_v62, 0.0 }
 0x409   : > { %v1254_v1 = vpop.f32.mrb[38].mxu0  ;;  %v1297_v3 = vpop.f32.mrb[38].mxu1  ;;  %v1475_v13 = vmax.f32 %v1252_v63, 0.0  ;;  %v1477_v14 = vmax.f32 %v1295_v0, 0.0 }
 0x40a   : > { %v1486_v9 = vmax.f32 %v1254_v1, 0.0  ;;  %v1488_v10 = vmax.f32 %v1297_v3, 0.0  ;;  %v1256_v11 = vpop.f32.mrb[39].mxu0  ;;  %v1299_v12 = vpop.f32.mrb[39].mxu1 }
 0x40b   : > { %v1487_v15 = vmax.f32 %v1256_v11, 0.0  ;;  %v1489_v16 = vmax.f32 %v1299_v12, 0.0 }
 0x40c   : > { %v1498_v17 = vpack.c.bf16 %v1486_v9, %v1474_v7  ;;  %v1500_v18 = vpack.c.bf16 %v1488_v10, %v1476_v8 }
 0x40d   : > { %v1499_v19 = vpack.c.bf16 %v1487_v15, %v1475_v13  ;;  %v1501_v20 = vpack.c.bf16 %v1489_v16, %v1477_v14 }
 0x40f   : > { %v1336_v22 = vpop.f32.mrb[40].mxu0  ;;  %v1379_v23 = vpop.f32.mrb[40].mxu1  ;;  %1515 = vmatprep.subr.bf16.mxu0 %v1499_v19  ;;  %1558 = vmatprep.subr.bf16.mxu1 %v1501_v20 }
 0x410   : > { %v1338_v30 = vpop.f32.mrb[41].mxu0  ;;  %v1381_v31 = vpop.f32.mrb[41].mxu1  ;;  %1516 = vmatpush1.bf16.msra.mxu0 %v1498_v17  ;;  %1559 = vmatpush1.bf16.msra.mxu1 %v1500_v18  ;;  %v1478_v34 = vmax.f32 %v1336_v22, 0.0  ;;  %v1480_v24 = vmax.f32 %v1379_v23, 0.0 }
 0x411   : > { %v1340_v32 = vpop.f32.mrb[42].mxu0  ;;  %v1383_v33 = vpop.f32.mrb[42].mxu1  ;;  %v1479_v39 = vmax.f32 %v1338_v30, 0.0  ;;  %v1481_v40 = vmax.f32 %v1381_v31, 0.0 }
 0x412   : > { %v1490_v35 = vmax.f32 %v1340_v32, 0.0  ;;  %v1492_v36 = vmax.f32 %v1383_v33, 0.0  ;;  %v1342_v37 = vpop.f32.mrb[43].mxu0  ;;  %v1385_v38 = vpop.f32.mrb[43].mxu1 }
 0x413   : > { %v1491_v41 = vmax.f32 %v1342_v37, 0.0  ;;  %v1493_v29 = vmax.f32 %v1385_v38, 0.0  ;;  %2528 = vmatmul.mubr.msk.bf16.vlgmr.msra.gmra.mrb[48].mxu0 %vm315_vm0, %v1511_v21  ;;  %2529 = vmatmul.mubr.msk.bf16.vlgmr.msra.gmra.mrb[48].mxu1 %vm315_vm0, %v1511_v21 }
 0x414   : > { %v1502_v43 = vpack.c.bf16 %v1490_v35, %v1478_v34  ;;  %v1504_v44 = vpack.c.bf16 %v1492_v36, %v1480_v24  ;;  %1633 = vmatprep.mubr.bf16.mxu0 %v2578_v2  ;;  %1676 = vmatprep.mubr.bf16.mxu1 %v2578_v2 }
 0x415   : > { %v1503_v45 = vpack.c.bf16 %v1491_v41, %v1479_v39  ;;  %v1505_v46 = vpack.c.bf16 %v1493_v29, %v1481_v40 }
 0x417   : > { %v1422_v47 = vpop.f32.mrb[44].mxu0  ;;  %v1465_v48 = vpop.f32.mrb[44].mxu1  ;;  %1601 = vmatprep.subr.bf16.mxu0 %v1503_v45  ;;  %1644 = vmatprep.subr.bf16.mxu1 %v1505_v46 }
 0x418   : > { %v1424_v27 = vpop.f32.mrb[45].mxu0  ;;  %v1467_v49 = vpop.f32.mrb[45].mxu1  ;;  %1602 = vmatpush1.bf16.msra.mxu0 %v1502_v43  ;;  %1645 = vmatpush1.bf16.msra.mxu1 %v1504_v44  ;;  %v1482_v53 = vmax.f32 %v1422_v47, 0.0  ;;  %v1484_v26 = vmax.f32 %v1465_v48, 0.0 }
 0x419   : > { %v1426_v50 = vpop.f32.mrb[46].mxu0  ;;  %v1469_v52 = vpop.f32.mrb[46].mxu1  ;;  %v1483_v58 = vmax.f32 %v1424_v27, 0.0  ;;  %v1485_v59 = vmax.f32 %v1467_v49, 0.0 }
 0x41a   : > { %v1494_v54 = vmax.f32 %v1426_v50, 0.0  ;;  %v1496_v55 = vmax.f32 %v1469_v52, 0.0  ;;  %v1428_v56 = vpop.f32.mrb[47].mxu0  ;;  %v1471_v57 = vpop.f32.mrb[47].mxu1 }
 0x41b   : > { %v1495_v60 = vmax.f32 %v1428_v56, 0.0  ;;  %v1497_v61 = vmax.f32 %v1471_v57, 0.0  ;;  %2530 = vmatmul.mubr.msk.bf16.vlgmr.msra.gmra.mrb[52].mxu0 %vm315_vm0, %v1511_v21  ;;  %2531 = vmatmul.mubr.msk.bf16.vlgmr.msra.gmra.mrb[52].mxu1 %vm315_vm0, %v1511_v21 }
 0x41c   : > { %v1506_v25 = vpack.c.bf16 %v1494_v54, %v1482_v53  ;;  %v1508_v28 = vpack.c.bf16 %v1496_v55, %v1484_v26  ;;  %1719 = vmatprep.mubr.bf16.mxu0 %v2578_v2  ;;  %1762 = vmatprep.mubr.bf16.mxu1 %v2578_v2 }
 0x41d   : > { %v1507_v42 = vpack.c.bf16 %v1495_v60, %v1483_v58  ;;  %v1509_v51 = vpack.c.bf16 %v1497_v61, %v1485_v59 }
 0x41f   : > { %1687 = vmatprep.subr.bf16.mxu0 %v1507_v42  ;;  %1730 = vmatprep.subr.bf16.mxu1 %v1509_v51 }
 0x420   : > { %1688 = vmatpush1.bf16.msra.mxu0 %v1506_v25  ;;  %1731 = vmatpush1.bf16.msra.mxu1 %v1508_v28 }
 0x423   : > { %2532 = vmatmul.mubr.msk.bf16.vlgmr.msra.gmra.mrb[56].mxu0 %vm315_vm0, %v1511_v21  ;;  %2533 = vmatmul.mubr.msk.bf16.vlgmr.msra.gmra.mrb[56].mxu1 %vm315_vm0, %v1511_v21  ;;  %v1810_v21 = vpop.permute.xlu1 %1809 }
 0x424   : > { %1846 = vmatprep.mubr.bf16.mxu0 %v2578_v2  ;;  %1889 = vmatprep.mubr.bf16.mxu1 %v2578_v2 }
 0x4e6   : > { %v1549_v62 = vpop.f32.mrb[48].mxu0  ;;  %v1592_v63 = vpop.f32.mrb[48].mxu1 }
 0x4e7   : > { %v1551_v0 = vpop.f32.mrb[49].mxu0  ;;  %v1594_v1 = vpop.f32.mrb[49].mxu1  ;;  %v1773_v8 = vmax.f32 %v1549_v62, 0.0  ;;  %v1775_v9 = vmax.f32 %v1592_v63, 0.0 }
 0x4e8   : > { %v1553_v3 = vpop.f32.mrb[50].mxu0  ;;  %v1596_v7 = vpop.f32.mrb[50].mxu1  ;;  %v1774_v14 = vmax.f32 %v1551_v0, 0.0  ;;  %v1776_v15 = vmax.f32 %v1594_v1, 0.0 }
 0x4e9   : > { %v1785_v10 = vmax.f32 %v1553_v3, 0.0  ;;  %v1787_v11 = vmax.f32 %v1596_v7, 0.0  ;;  %v1555_v12 = vpop.f32.mrb[51].mxu0  ;;  %v1598_v13 = vpop.f32.mrb[51].mxu1 }
 0x4ea   : > { %v1786_v16 = vmax.f32 %v1555_v12, 0.0  ;;  %v1788_v17 = vmax.f32 %v1598_v13, 0.0 }
 0x4eb   : > { %v1797_v18 = vpack.c.bf16 %v1785_v10, %v1773_v8  ;;  %v1799_v19 = vpack.c.bf16 %v1787_v11, %v1775_v9 }
 0x4ec   : > { %v1798_v20 = vpack.c.bf16 %v1786_v16, %v1774_v14  ;;  %v1800_v4 = vpack.c.bf16 %v1788_v17, %v1776_v15 }
 0x4ee   : > { %v1635_v22 = vpop.f32.mrb[52].mxu0  ;;  %v1678_v23 = vpop.f32.mrb[52].mxu1  ;;  %1814 = vmatprep.subr.bf16.mxu0 %v1798_v20  ;;  %1857 = vmatprep.subr.bf16.mxu1 %v1800_v4 }
 0x4ef   : > { %v1637_v30 = vpop.f32.mrb[53].mxu0  ;;  %v1680_v31 = vpop.f32.mrb[53].mxu1  ;;  %1815 = vmatpush1.bf16.msra.mxu0 %v1797_v18  ;;  %1858 = vmatpush1.bf16.msra.mxu1 %v1799_v19  ;;  %v1777_v34 = vmax.f32 %v1635_v22, 0.0  ;;  %v1779_v24 = vmax.f32 %v1678_v23, 0.0 }
 0x4f0   : > { %v1639_v32 = vpop.f32.mrb[54].mxu0  ;;  %v1682_v33 = vpop.f32.mrb[54].mxu1  ;;  %v1778_v39 = vmax.f32 %v1637_v30, 0.0  ;;  %v1780_v40 = vmax.f32 %v1680_v31, 0.0 }
 0x4f1   : > { %v1789_v35 = vmax.f32 %v1639_v32, 0.0  ;;  %v1791_v36 = vmax.f32 %v1682_v33, 0.0  ;;  %v1641_v37 = vpop.f32.mrb[55].mxu0  ;;  %v1684_v38 = vpop.f32.mrb[55].mxu1 }
 0x4f2   : > { %v1790_v41 = vmax.f32 %v1641_v37, 0.0  ;;  %v1792_v29 = vmax.f32 %v1684_v38, 0.0  ;;  %2534 = vmatmul.mubr.msk.bf16.vlgmr.msra.gmra.mrb[60].mxu0 %vm315_vm0, %v1810_v21  ;;  %2535 = vmatmul.mubr.msk.bf16.vlgmr.msra.gmra.mrb[60].mxu1 %vm315_vm0, %v1810_v21 }
 0x4f3   : > { %v1801_v43 = vpack.c.bf16 %v1789_v35, %v1777_v34  ;;  %v1803_v44 = vpack.c.bf16 %v1791_v36, %v1779_v24  ;;  %1932 = vmatprep.mubr.bf16.mxu0 %v2578_v2  ;;  %1975 = vmatprep.mubr.bf16.mxu1 %v2578_v2 }
 0x4f4   : > { %v1802_v45 = vpack.c.bf16 %v1790_v41, %v1778_v39  ;;  %v1804_v46 = vpack.c.bf16 %v1792_v29, %v1780_v40 }
 0x4f6   : > { %v1721_v47 = vpop.f32.mrb[56].mxu0  ;;  %v1764_v48 = vpop.f32.mrb[56].mxu1  ;;  %1900 = vmatprep.subr.bf16.mxu0 %v1802_v45  ;;  %1943 = vmatprep.subr.bf16.mxu1 %v1804_v46 }
 0x4f7   : > { %v1723_v27 = vpop.f32.mrb[57].mxu0  ;;  %v1766_v49 = vpop.f32.mrb[57].mxu1  ;;  %1901 = vmatpush1.bf16.msra.mxu0 %v1801_v43  ;;  %1944 = vmatpush1.bf16.msra.mxu1 %v1803_v44  ;;  %v1781_v53 = vmax.f32 %v1721_v47, 0.0  ;;  %v1783_v26 = vmax.f32 %v1764_v48, 0.0 }
 0x4f8   : > { %v1725_v50 = vpop.f32.mrb[58].mxu0  ;;  %v1768_v52 = vpop.f32.mrb[58].mxu1  ;;  %v1782_v58 = vmax.f32 %v1723_v27, 0.0  ;;  %v1784_v59 = vmax.f32 %v1766_v49, 0.0 }
 0x4f9   : > { %v1793_v54 = vmax.f32 %v1725_v50, 0.0  ;;  %v1795_v55 = vmax.f32 %v1768_v52, 0.0  ;;  %v1727_v56 = vpop.f32.mrb[59].mxu0  ;;  %v1770_v57 = vpop.f32.mrb[59].mxu1 }
 0x4fa   : > { %v1794_v60 = vmax.f32 %v1727_v56, 0.0  ;;  %v1796_v61 = vmax.f32 %v1770_v57, 0.0  ;;  %2536 = vmatmul.mubr.msk.bf16.vlgmr.msra.gmra.mrb[64].mxu0 %vm315_vm0, %v1810_v21  ;;  %2537 = vmatmul.mubr.msk.bf16.vlgmr.msra.gmra.mrb[64].mxu1 %vm315_vm0, %v1810_v21 }
 0x4fb   : > { %v1805_v25 = vpack.c.bf16 %v1793_v54, %v1781_v53  ;;  %v1807_v28 = vpack.c.bf16 %v1795_v55, %v1783_v26  ;;  %2018 = vmatprep.mubr.bf16.mxu0 %v2578_v2  ;;  %2061 = vmatprep.mubr.bf16.mxu1 %v2578_v2 }
 0x4fc   : > { %v1806_v42 = vpack.c.bf16 %v1794_v60, %v1782_v58  ;;  %v1808_v51 = vpack.c.bf16 %v1796_v61, %v1784_v59 }
 0x4fe   : > { %1986 = vmatprep.subr.bf16.mxu0 %v1806_v42  ;;  %2029 = vmatprep.subr.bf16.mxu1 %v1808_v51 }
 0x4ff   : > { %1987 = vmatpush1.bf16.msra.mxu0 %v1805_v25  ;;  %2030 = vmatpush1.bf16.msra.mxu1 %v1807_v28 }
 0x502   : > { %2538 = vmatmul.mubr.msk.bf16.vlgmr.msra.gmra.mrb[68].mxu0 %vm315_vm0, %v1810_v21  ;;  %2539 = vmatmul.mubr.msk.bf16.vlgmr.msra.gmra.mrb[68].mxu1 %vm315_vm0, %v1810_v21  ;;  %v2109_v21 = vpop.permute.xlu0 %2108 }
 0x503   : > { %2145 = vmatprep.mubr.bf16.mxu0 %v2578_v2  ;;  %2186 = vmatprep.mubr.bf16.mxu1 %v2578_v2 }
 0x5c5   : > { %v1848_v62 = vpop.f32.mrb[60].mxu0  ;;  %v1891_v63 = vpop.f32.mrb[60].mxu1 }
 0x5c6   : > { %v1850_v0 = vpop.f32.mrb[61].mxu0  ;;  %v1893_v1 = vpop.f32.mrb[61].mxu1  ;;  %v2072_v8 = vmax.f32 %v1848_v62, 0.0  ;;  %v2074_v9 = vmax.f32 %v1891_v63, 0.0  ;;  %v2586_v62 = vmov 1966171168  }
 0x5c7   : > { %v1852_v3 = vpop.f32.mrb[62].mxu0  ;;  %v1895_v7 = vpop.f32.mrb[62].mxu1  ;;  %v2073_v14 = vmax.f32 %v1850_v0, 0.0  ;;  %v2075_v15 = vmax.f32 %v1893_v1, 0.0  ;;  %v2376_v63 = vunpack.c.l.s4 %v2586_v62 }
 0x5c8   : > { %v2084_v10 = vmax.f32 %v1852_v3, 0.0  ;;  %v2086_v11 = vmax.f32 %v1895_v7, 0.0  ;;  %v1854_v12 = vpop.f32.mrb[63].mxu0  ;;  %v1897_v13 = vpop.f32.mrb[63].mxu1 }
 0x5c9   : > { %v2085_v16 = vmax.f32 %v1854_v12, 0.0  ;;  %v2087_v17 = vmax.f32 %v1897_v13, 0.0  ;;  %v2377_v0 = vunpack.c.0.s8 %v2376_v63 }
 0x5ca   : > { %v2096_v18 = vpack.c.bf16 %v2084_v10, %v2072_v8  ;;  %v2098_v19 = vpack.c.bf16 %v2086_v11, %v2074_v9 }
 0x5cb   : > { %v2097_v20 = vpack.c.bf16 %v2085_v16, %v2073_v14  ;;  %v2099_v4 = vpack.c.bf16 %v2087_v17, %v2075_v15  ;;  %v2380_v7 = vsub.s32 %v2377_v0, %v2626_v6 }
 0x5cd   : > { %v1934_v22 = vpop.f32.mrb[64].mxu0  ;;  %v1977_v23 = vpop.f32.mrb[64].mxu1  ;;  %2113 = vmatprep.subr.bf16.mxu0 %v2097_v20  ;;  %2154 = vmatprep.subr.bf16.mxu1 %v2099_v4 }
 0x5ce   : > { %v1936_v30 = vpop.f32.mrb[65].mxu0  ;;  %v1979_v31 = vpop.f32.mrb[65].mxu1  ;;  %2114 = vmatpush1.bf16.msra.mxu0 %v2096_v18  ;;  %2155 = vmatpush1.bf16.msra.mxu1 %v2098_v19  ;;  %v2076_v34 = vmax.f32 %v1934_v22, 0.0  ;;  %v2078_v24 = vmax.f32 %v1977_v23, 0.0 }
 0x5cf   : > { %v1938_v32 = vpop.f32.mrb[66].mxu0  ;;  %v1981_v33 = vpop.f32.mrb[66].mxu1  ;;  %v2077_v39 = vmax.f32 %v1936_v30, 0.0  ;;  %v2079_v40 = vmax.f32 %v1979_v31, 0.0 }
 0x5d0   : > { %v2088_v35 = vmax.f32 %v1938_v32, 0.0  ;;  %v2090_v36 = vmax.f32 %v1981_v33, 0.0  ;;  %v1940_v37 = vpop.f32.mrb[67].mxu0  ;;  %v1983_v38 = vpop.f32.mrb[67].mxu1 }
 0x5d1   : > { %v2089_v41 = vmax.f32 %v1940_v37, 0.0  ;;  %v2091_v29 = vmax.f32 %v1983_v38, 0.0  ;;  %2540 = vmatmul.mubr.msk.bf16.vlgmr.msra.gmra.mrb[72].mxu0 %vm315_vm0, %v2109_v21  ;;  %2541 = vmatmul.mubr.msk.bf16.vlgmr.msra.gmra.mrb[72].mxu1 %vm315_vm0, %v2109_v21 }
 0x5d2   : > { %v2100_v43 = vpack.c.bf16 %v2088_v35, %v2076_v34  ;;  %v2102_v44 = vpack.c.bf16 %v2090_v36, %v2078_v24  ;;  %2227 = vmatprep.mubr.bf16.mxu0 %v2578_v2  ;;  %2268 = vmatprep.mubr.bf16.mxu1 %v2578_v2 }
 0x5d3   : > { %v2101_v45 = vpack.c.bf16 %v2089_v41, %v2077_v39  ;;  %v2103_v46 = vpack.c.bf16 %v2091_v29, %v2079_v40 }
 0x5d5   : > { %v2020_v47 = vpop.f32.mrb[68].mxu0  ;;  %v2063_v48 = vpop.f32.mrb[68].mxu1  ;;  %2195 = vmatprep.subr.bf16.mxu0 %v2101_v45  ;;  %2236 = vmatprep.subr.bf16.mxu1 %v2103_v46 }
 0x5d6   : > { %v2022_v27 = vpop.f32.mrb[69].mxu0  ;;  %v2065_v49 = vpop.f32.mrb[69].mxu1  ;;  %2196 = vmatpush1.bf16.msra.mxu0 %v2100_v43  ;;  %2237 = vmatpush1.bf16.msra.mxu1 %v2102_v44  ;;  %v2080_v53 = vmax.f32 %v2020_v47, 0.0  ;;  %v2082_v26 = vmax.f32 %v2063_v48, 0.0 }
 0x5d7   : > { %v2024_v50 = vpop.f32.mrb[70].mxu0  ;;  %v2067_v52 = vpop.f32.mrb[70].mxu1  ;;  %v2081_v58 = vmax.f32 %v2022_v27, 0.0  ;;  %v2083_v59 = vmax.f32 %v2065_v49, 0.0 }
 0x5d8   : > { %v2092_v54 = vmax.f32 %v2024_v50, 0.0  ;;  %v2094_v55 = vmax.f32 %v2067_v52, 0.0  ;;  %v2026_v56 = vpop.f32.mrb[71].mxu0  ;;  %v2069_v57 = vpop.f32.mrb[71].mxu1 }
 0x5d9   : > { %v2093_v60 = vmax.f32 %v2026_v56, 0.0  ;;  %v2095_v61 = vmax.f32 %v2069_v57, 0.0  ;;  %2542 = vmatmul.mubr.msk.bf16.vlgmr.msra.gmra.mrb[76].mxu0 %vm315_vm0, %v2109_v21  ;;  %2543 = vmatmul.mubr.msk.bf16.vlgmr.msra.gmra.mrb[76].mxu1 %vm315_vm0, %v2109_v21 }
 0x5da   : > { %v2104_v25 = vpack.c.bf16 %v2092_v54, %v2080_v53  ;;  %v2106_v28 = vpack.c.bf16 %v2094_v55, %v2082_v26  ;;  %2309 = vmatprep.mubr.bf16.mxu0 %v2578_v2  ;;  %2350 = vmatprep.mubr.bf16.mxu1 %v2578_v2 }
 0x5db   : > { %v2105_v42 = vpack.c.bf16 %v2093_v60, %v2081_v58  ;;  %v2107_v51 = vpack.c.bf16 %v2095_v61, %v2083_v59 }
 0x5dd   : > { %2277 = vmatprep.subr.bf16.mxu0 %v2105_v42  ;;  %2318 = vmatprep.subr.bf16.mxu1 %v2107_v51 }
 0x5de   : > { %2278 = vmatpush1.bf16.msra.mxu0 %v2104_v25  ;;  %2319 = vmatpush1.bf16.msra.mxu1 %v2106_v28 }
 0x5e1   : > { %2544 = vmatmul.mubr.msk.bf16.vlgmr.msra.gmra.mrb[80].mxu0 %vm315_vm0, %v2109_v21  ;;  %2545 = vmatmul.mubr.msk.bf16.vlgmr.msra.gmra.mrb[80].mxu1 %vm315_vm0, %v2109_v21 }
 0x6a4   : > { %v2147_v1 = vpop.f32.mrb[72].mxu0  ;;  %v2188_v3 = vpop.f32.mrb[72].mxu1 }
 0x6a5   : > { %v2149_v8 = vpop.f32.mrb[73].mxu0  ;;  %v2190_v9 = vpop.f32.mrb[73].mxu1 }
 0x6a6   : > { %v2371_v2 = vcombine.low %v2147_v1, %v2149_v8  ;;  %v2372_v10 = vcombine.low %v2188_v3, %v2190_v9  ;;  %v2151_v11 = vpop.f32.mrb[74].mxu0  ;;  %v2192_v12 = vpop.f32.mrb[74].mxu1 }
 0x6a7   : > { %v2152_v13 = vpop.f32.mrb[75].mxu0  ;;  %v2193_v14 = vpop.f32.mrb[75].mxu1 }
 0x6a8   : > { %v2381_v15 = vrot.slane %v2371_v2, %v2380_v7  ;;  %v2388_v16 = vrot.slane %v2372_v10, %v2380_v7 }
 0x6aa   : > { %v2403_v17 = vcombine.low %v2381_v15, %v2388_v16 }
 0x6ac   : > { %v2229_v18 = vpop.f32.mrb[76].mxu0  ;;  %v2270_v19 = vpop.f32.mrb[76].mxu1  ;;  %v2411_v24 = vrot.slane %v2403_v17, %v2380_v7 }
 0x6ad   : > { %v2231_v20 = vpop.f32.mrb[77].mxu0  ;;  %v2272_v4 = vpop.f32.mrb[77].mxu1 }
 0x6ae   : > { %v2373_v21 = vcombine.low %v2229_v18, %v2231_v20  ;;  %v2374_v22 = vcombine.low %v2270_v19, %v2272_v4  ;;  %v2233_v23 = vpop.f32.mrb[78].mxu0  ;;  %v2274_v6 = vpop.f32.mrb[78].mxu1 }
 0x6af   : > { %v2234_v30 = vpop.f32.mrb[79].mxu0  ;;  %v2275_v31 = vpop.f32.mrb[79].mxu1 }
 0x6b0   : > { %v2395_v32 = vrot.slane %v2373_v21, %v2380_v7  ;;  %v2402_v33 = vrot.slane %v2374_v22, %v2380_v7 }
 0x6b2   : > { %v2404_v34 = vcombine.low %v2395_v32, %v2402_v33 }
 0x6b4   : > { %v2418_v35 = vrot.slane %v2404_v34, %v2380_v7  ;;  %v2311_v36 = vpop.f32.mrb[80].mxu0  ;;  %v2352_v37 = vpop.f32.mrb[80].mxu1 }
 0x6b5   : > { %v2313_v38 = vpop.f32.mrb[81].mxu0  ;;  %v2354_v39 = vpop.f32.mrb[81].mxu1 }
 0x6b6   : > { %v2419_v40 = vcombine.low %v2411_v24, %v2418_v35  ;;  %v2420_v41 = vcombine.low %v2311_v36, %v2313_v38  ;;  %v2421_v29 = vcombine.low %v2352_v37, %v2354_v39  ;;  %v2315_v43 = vpop.f32.mrb[82].mxu0  ;;  %v2356_v44 = vpop.f32.mrb[82].mxu1 }
 0x6b7   : > { %v2316_v45 = vpop.f32.mrb[83].mxu0  ;;  %v2357_v46 = vpop.f32.mrb[83].mxu1 }
 0x6b8   : > { %2446 = vst [vmem:[%s140_s28] sm:$0xff] %v2419_v40  ;;  %v2428_v47 = vrot.slane %v2420_v41, %v2380_v7  ;;  %v2435_v48 = vrot.slane %v2421_v29, %v2380_v7 }
 0x6ba   : > { %v2436_v27 = vcombine.low %v2428_v47, %v2435_v48 }
 0x6bc   : > { %v2443_v49 = vrot.slane %v2436_v27, %v2380_v7 }
 0x6be   : > { %2451 = vst.msk [vmem:[%s140_s28 + $0x8] sm:$0xf] %vm2449_vm1, %v2443_v49 }
 0x6bf PF: > { %s12_s9 = sadd.s32 1, %s2575_s9  }
 0x6c0   : > { %p9_p4 = scmp.ge.s32.totalorder %s12_s9, 4  }
 0x6c2   :  { %11 = sbr.rel (!%p9_p4) target bundleno = 1 (0x1), region = 58 }

</bundles_post_ra>
